<compile_context>
chip_gen: v7x
topology: tpu7x:2x2x1
jax: 0.10.0
libtpu: 0.0.40
codegen_flags: <defaults>
</compile_context>

<pallas_src>
import functools
import math

import jax
import jax.numpy as jnp
from jax.experimental import pallas as pl
from jax.experimental.pallas import tpu as pltpu

LOG_STD_MAX = 2.0
LOG_STD_MIN = -20.0


# ----------------------------------------------------------------------------
# Kernel
# ----------------------------------------------------------------------------
def _morph_kernel(
    obs_ref,   # (T, obs)            input dtype (cast to compute dtype in-kernel)
    act_ref,   # (T, act)            input dtype
    w1o_ref,   # (obs, 2H)           compute dtype   [W1_obs | 0]
    w1a_ref,   # (act, 2H)           compute dtype   [W1_act | W3]
    b1_ref,    # (1, 2H)             f32             [b1 | b3]
    w2_ref,    # (2H, 2H)            compute dtype   blockdiag(W2, W4)
    b2_ref,    # (1, 2H)             f32             [b2 | b4]
    wh_ref,    # (2H, out_pad)       compute dtype   blockdiag([Wfm|Wfs],[Wwm|Wws]) + 0-pad
    bh_ref,    # (1, out_pad)        f32             [bfm|bfs|bwm|bws|0-pad]
    out_ref,   # (T, out_pad)        f32             [fw_mu|fw_std|w_mu|w_std|pad]
    *,
    obs_dim,
):
    f32 = jnp.float32
    cd = w1o_ref.dtype
    obs = obs_ref[...].astype(cd)
    act = act_ref[...].astype(cd)

    # Layer 1, both branches fused along the lane axis:
    #   h[:, :H] = obs @ W1_obs + act @ W1_act + b1     (state_action branch)
    #   h[:, H:] =                act @ W3     + b3     (action branch)
    h = (jnp.dot(obs, w1o_ref[...], preferred_element_type=f32)
         + jnp.dot(act, w1a_ref[...], preferred_element_type=f32)
         + b1_ref[...])
    h = jnp.maximum(h, 0.0).astype(cd)

    # Layer 2: block-diagonal(W2, W4); ReLU (the Sequential's output ReLU).
    h2 = jnp.dot(h, w2_ref[...], preferred_element_type=f32) + b2_ref[...]
    h2 = jnp.maximum(h2, 0.0).astype(cd)

    # Heads: block-diagonal([Wfm|Wfs], [Wwm|Wws]) zero-padded to out_pad lanes;
    # z is born packed as [fw_mu | fw_log_std | w_mu | w_log_std | pad].
    z = jnp.dot(h2, wh_ref[...], preferred_element_type=f32) + bh_ref[...]

    # One lane mask for the single fused head: std lanes are the odd obs_dim
    # sized groups.  clip bounds exp's argument, so computing exp on all lanes
    # and selecting is safe (no overflow can leak through the where).
    lane = jax.lax.broadcasted_iota(jnp.int32, z.shape, 1)
    is_std = (lane % (2 * obs_dim)) >= obs_dim
    std = jnp.exp(jnp.clip(z, LOG_STD_MIN, LOG_STD_MAX))
    out_ref[...] = jnp.where(is_std, std, z)


# ----------------------------------------------------------------------------
# Parameter packing (one-time; keep out of the per-call hot path)
# ----------------------------------------------------------------------------
def _default_compute_dtype():
    """bf16 on v6e / v7x (native MXU path, half the DMA bytes), f32 elsewhere."""
    try:
        kind = jax.devices()[0].device_kind.lower()
    except Exception:
        return jnp.float32
    if any(tag in kind for tag in ("v6", "v7", "7x")):
        return jnp.bfloat16
    return jnp.float32


def prepare_params(params, *, compute_dtype=None):
    """Pack PyTorch-shaped params into block-diagonal, lane-dense kernel arrays.

    Call once; pass the returned dict (arrays only) into the jitted forward.
    """
    cd = _default_compute_dtype() if compute_dtype is None else compute_dtype
    p = params
    act_dim = p["w3"].shape[0]
    hidden = p["w2"].shape[0]
    obs_dim = p["wfm"].shape[1]
    assert p["w1"].shape[0] == obs_dim + act_dim

    f32 = jnp.float32
    zeros_oh = jnp.zeros((obs_dim, hidden), f32)
    zeros_hh = jnp.zeros((hidden, hidden), f32)

    # Layer 1: split by input rows (obs / action), fused across branches on lanes.
    w1o = jnp.concatenate([p["w1"][:obs_dim], zeros_oh], axis=1)        # (obs, 2H)
    w1a = jnp.concatenate([p["w1"][obs_dim:], p["w3"]], axis=1)         # (act, 2H)
    b1 = jnp.concatenate([p["b1"], p["b3"]])[None, :]                   # (1, 2H)

    # Layer 2: block-diagonal(W2, W4).
    w2 = jnp.concatenate(
        [jnp.concatenate([p["w2"], zeros_hh], axis=1),
         jnp.concatenate([zeros_hh, p["w4"]], axis=1)], axis=0)         # (2H, 2H)
    b2 = jnp.concatenate([p["b2"], p["b4"]])[None, :]                   # (1, 2H)

    # Heads: block-diagonal([Wfm|Wfs], [Wwm|Wws]); zero-pad to a 128-multiple of
    # lanes so the kernel's output store is unmasked and lane-dense.
    out_dim = 4 * obs_dim
    out_pad = max(128, ((out_dim + 127) // 128) * 128)
    zeros_h2o = jnp.zeros((hidden, 2 * obs_dim), f32)
    wh = jnp.concatenate(
        [jnp.concatenate([p["wfm"], p["wfs"], zeros_h2o], axis=1),
         jnp.concatenate([zeros_h2o, p["wwm"], p["wws"]], axis=1)], axis=0)
    wh = jnp.pad(wh, ((0, 0), (0, out_pad - out_dim)))                  # (2H, out_pad)
    bh = jnp.concatenate([p["bfm"], p["bfs"], p["bwm"], p["bws"]])
    bh = jnp.pad(bh, (0, out_pad - out_dim))[None, :]                   # (1, out_pad)

    return dict(
        w1o=w1o.astype(cd), w1a=w1a.astype(cd), b1=b1.astype(f32),
        w2=w2.astype(cd), b2=b2.astype(f32),
        wh=wh.astype(cd), bh=bh.astype(f32),
    )


# ----------------------------------------------------------------------------
# Wrapper
# ----------------------------------------------------------------------------
def _pick_batch_tile(batch):
    """Prefer >=2 grid steps (pipelining + v7x megacore). Tile is a multiple of
    8 dividing batch, preferably 256..2048 rows; falls back to batch itself."""
    if batch < 16 or batch % 8 != 0:
        return batch
    divisors = [d for d in range(8, batch // 2 + 1, 8) if batch % d == 0]
    if not divisors:
        return batch
    preferred = [d for d in divisors if 256 <= d <= 2048]
    if preferred:
        return max(preferred)
    capped = [d for d in divisors if d <= 2048]
    return max(capped) if capped else max(divisors)


def morphological_networks_forward(
    obs, action, packed, *, batch_tile=None, return_packed=False,
    single_buffer_weights=None,
):
    """Forward pass.  Returns (fw_mu, fw_std, w_mu, w_std) — the Normal(mu, std)
    parameters — or, with return_packed=True, the lane-dense packed buffer
    (B, out_pad) laid out as [fw_mu | fw_std | w_mu | w_std | zero-pad]."""
    B, obs_dim = obs.shape
    act_dim = action.shape[1]
    two_h = packed["w2"].shape[0]
    out_pad = packed["wh"].shape[1]
    assert packed["w1o"].shape == (obs_dim, two_h)
    assert packed["w1a"].shape == (act_dim, two_h)

    if batch_tile is None:
        batch_tile = _pick_batch_tile(B)
    assert B % batch_tile == 0
    grid = (B // batch_tile,)

    weight_arrays = (packed["w1o"], packed["w1a"], packed["b1"],
                     packed["w2"], packed["b2"], packed["wh"], packed["bh"])
    if single_buffer_weights is None:
        # Default double-buffering of constant-index weights only matters when
        # the resident weights are big enough to pressure VMEM (v7x: 64 MiB).
        weight_bytes = sum(int(a.size) * a.dtype.itemsize for a in weight_arrays)
        single_buffer_weights = weight_bytes > (4 << 20)

    def weight_spec(shape):
        if single_buffer_weights:
            return pl.BlockSpec(shape, lambda i: (0, 0),
                                pipeline_mode=pl.Buffered(1))
        return pl.BlockSpec(shape, lambda i: (0, 0))

    kernel = functools.partial(_morph_kernel, obs_dim=obs_dim)

    out = pl.pallas_call(
        kernel,
        out_shape=jax.ShapeDtypeStruct((B, out_pad), jnp.float32),
        grid_spec=pltpu.PrefetchScalarGridSpec(
            num_scalar_prefetch=0,
            grid=grid,
            in_specs=[
                pl.BlockSpec((batch_tile, obs_dim), lambda i: (i, 0)),
                pl.BlockSpec((batch_tile, act_dim), lambda i: (i, 0)),
                weight_spec(packed["w1o"].shape),
                weight_spec(packed["w1a"].shape),
                weight_spec(packed["b1"].shape),
                weight_spec(packed["w2"].shape),
                weight_spec(packed["b2"].shape),
                weight_spec(packed["wh"].shape),
                weight_spec(packed["bh"].shape),
            ],
            out_specs=pl.BlockSpec((batch_tile, out_pad), lambda i: (i, 0)),
        ),
        compiler_params=pltpu.CompilerParams(
            dimension_semantics=("parallel",),
            vmem_limit_bytes=48 * 1024 * 1024,
        ),
    )(obs, action, *weight_arrays)

    if return_packed:
        return out
    fw_mu = out[:, 0 * obs_dim:1 * obs_dim]
    fw_std = out[:, 1 * obs_dim:2 * obs_dim]
    w_mu = out[:, 2 * obs_dim:3 * obs_dim]
    w_std = out[:, 3 * obs_dim:4 * obs_dim]
    return fw_mu, fw_std, w_mu, w_std


# ----------------------------------------------------------------------------
# Synthetic params + pure-JAX reference (mirrors the PyTorch module)
# ----------------------------------------------------------------------------
def make_params(key, obs_dim, act_dim, hidden):
    """Deterministic synthetic parameters (PyTorch Linear shapes, stored transposed)."""
    ks = jax.random.split(key, 16)

    def lin(kw, kb, fan_in, fan_out):
        bound = 1.0 / math.sqrt(fan_in)
        w = jax.random.uniform(kw, (fan_in, fan_out), jnp.float32, -bound, bound)
        b = jax.random.uniform(kb, (fan_out,), jnp.float32, -bound, bound)
        return w, b

    w1, b1 = lin(ks[0], ks[1], obs_dim + act_dim, hidden)
    w2, b2 = lin(ks[2], ks[3], hidden, hidden)
    wfm, bfm = lin(ks[4], ks[5], hidden, obs_dim)
    wfs, bfs = lin(ks[6], ks[7], hidden, obs_dim)
    w3, b3 = lin(ks[8], ks[9], act_dim, hidden)
    w4, b4 = lin(ks[10], ks[11], hidden, hidden)
    wwm, bwm = lin(ks[12], ks[13], hidden, obs_dim)
    wws, bws = lin(ks[14], ks[15], hidden, obs_dim)

    return dict(
        w1=w1, b1=b1, w2=w2, b2=b2,
        wfm=wfm, bfm=bfm, wfs=wfs, bfs=bfs,
        w3=w3, b3=b3, w4=w4, b4=b4,
        wwm=wwm, bwm=bwm, wws=wws, bws=bws,
    )


def reference_forward(obs, action, p, compute_dtype=jnp.float32):
    """Pure-JAX reference mirroring the PyTorch module (matching compute dtype)."""
    cd = compute_dtype

    def lin(x, w, b):
        return jnp.dot(x.astype(cd), w.astype(cd),
                       preferred_element_type=jnp.float32) + b

    hx = jnp.concatenate([obs, action], axis=-1)
    h = jnp.maximum(lin(hx, p["w1"], p["b1"]), 0.0)
    h = jnp.maximum(lin(h, p["w2"], p["b2"]), 0.0)
    fw_mu = lin(h, p["wfm"], p["bfm"])
    fw_log_std = jnp.clip(lin(h, p["wfs"], p["bfs"]), LOG_STD_MIN, LOG_STD_MAX)

    g = jnp.maximum(lin(action, p["w3"], p["b3"]), 0.0)
    g = jnp.maximum(lin(g, p["w4"], p["b4"]), 0.0)
    w_mu = lin(g, p["wwm"], p["bwm"])
    w_log_std = jnp.clip(lin(g, p["wws"], p["bws"]), LOG_STD_MIN, LOG_STD_MAX)
    return fw_mu, jnp.exp(fw_log_std), w_mu, jnp.exp(w_log_std)


# ----------------------------------------------------------------------------
# Self-test
# ----------------------------------------------------------------------------
if __name__ == "__main__":
    B, OBS, ACT, HID = 8, 16, 4, 32

    key = jax.random.PRNGKey(0)
    k_obs, k_act, k_par = jax.random.split(key, 3)
    obs = jax.random.normal(k_obs, (B, OBS), jnp.float32)
    action = jax.random.normal(k_act, (B, ACT), jnp.float32)
    params = make_params(k_par, OBS, ACT, HID)

    fwd = jax.jit(morphological_networks_forward)

    # --- small-batch f32 path, tight check against the PyTorch-equivalent reference ---
    packed_f32 = prepare_params(params, compute_dtype=jnp.float32)
    outs = fwd(obs, action, packed_f32)
    jax.block_until_ready(outs)
    for got, want in zip(outs, reference_forward(obs, action, params)):
        assert got.shape == want.shape
        assert jnp.allclose(got, want, atol=1e-5, rtol=1e-5), "mismatch vs reference (f32)"

    # --- multi-step grid (pipelined / megacore-parallel path), still f32 ---
    B2 = 256
    obs2 = jax.random.normal(k_obs, (B2, OBS), jnp.float32)
    act2 = jax.random.normal(k_act, (B2, ACT), jnp.float32)
    assert _pick_batch_tile(B2) < B2  # >= 2 grid steps
    outs2 = fwd(obs2, act2, packed_f32)
    jax.block_until_ready(outs2)
    ref2 = reference_forward(obs2, act2, params)
    for got, want in zip(outs2, ref2):
        assert jnp.allclose(got, want, atol=1e-5, rtol=1e-5), "mismatch vs reference (tiled f32)"

    # --- packed, lane-dense output path (no wrapper re-slicing) ---
    packed_out = jax.jit(functools.partial(
        morphological_networks_forward, return_packed=True))(obs2, act2, packed_f32)
    jax.block_until_ready(packed_out)
    assert packed_out.shape[1] % 128 == 0
    assert jnp.allclose(packed_out[:, 0 * OBS:1 * OBS], ref2[0], atol=1e-5, rtol=1e-5)
    assert jnp.allclose(packed_out[:, 3 * OBS:4 * OBS], ref2[3], atol=1e-5, rtol=1e-5)

    # --- bf16 MXU path (f32 accumulation), checked against a bf16-matched reference ---
    packed_bf16 = prepare_params(params, compute_dtype=jnp.bfloat16)
    outs3 = fwd(obs2, act2, packed_bf16)
    jax.block_until_ready(outs3)
    ref3 = reference_forward(obs2, act2, params, compute_dtype=jnp.bfloat16)
    for got, want in zip(outs3, ref3):
        assert jnp.allclose(got, want, atol=5e-2, rtol=5e-2), "mismatch vs reference (bf16)"

    # --- default (auto) compute dtype: bf16 on v6e/v7x, f32 elsewhere ---
    packed_auto = prepare_params(params)
    cd = packed_auto["w1o"].dtype
    outs4 = fwd(obs2, act2, packed_auto)
    jax.block_until_ready(outs4)
    ref4 = reference_forward(obs2, act2, params, compute_dtype=cd)
    tol = 1e-5 if cd == jnp.float32 else 5e-2
    for got, want in zip(outs4, ref4):
        assert jnp.allclose(got, want, atol=tol, rtol=tol), "mismatch vs reference (auto dtype)"

    # TODO(synk): torch.distributions.Normal objects are not representable in a kernel;
    # the kernel returns the (mu, std) parameter tensors instead.
    print("KERNEL_OK")
</pallas_src>

<mosaic_0001>
module attributes {stable_mosaic.version = 11 : i64} {
  func.func @_morph_kernel(%arg0: i32, %arg1: memref<8x16xf32, #tpu.memory_space<vmem>>, %arg2: memref<8x4xf32, #tpu.memory_space<vmem>>, %arg3: memref<16x64xf32, #tpu.memory_space<vmem>>, %arg4: memref<4x64xf32, #tpu.memory_space<vmem>>, %arg5: memref<1x64xf32, #tpu.memory_space<vmem>>, %arg6: memref<64x64xf32, #tpu.memory_space<vmem>>, %arg7: memref<1x64xf32, #tpu.memory_space<vmem>>, %arg8: memref<64x128xf32, #tpu.memory_space<vmem>>, %arg9: memref<1x128xf32, #tpu.memory_space<vmem>>, %arg10: memref<8x128xf32, #tpu.memory_space<vmem>>) attributes {dimension_semantics = [#tpu.dimension_semantics<parallel>], iteration_bounds = array<i64: 1>, scalar_prefetch = 0 : i64, scratch_operands = 0 : i64, tpu.core_type = #tpu.core_type<tc>, window_params = [{transform_indices = @transform_0, window_bounds = array<i64: 8, 16>}, {transform_indices = @transform_1, window_bounds = array<i64: 8, 4>}, {pipeline_mode = #tpu.pipeline_mode<synchronous>, transform_indices = @transform_2, window_bounds = array<i64: 16, 64>}, {pipeline_mode = #tpu.pipeline_mode<synchronous>, transform_indices = @transform_3, window_bounds = array<i64: 4, 64>}, {pipeline_mode = #tpu.pipeline_mode<synchronous>, transform_indices = @transform_4, window_bounds = array<i64: 1, 64>}, {pipeline_mode = #tpu.pipeline_mode<synchronous>, transform_indices = @transform_5, window_bounds = array<i64: 64, 64>}, {pipeline_mode = #tpu.pipeline_mode<synchronous>, transform_indices = @transform_6, window_bounds = array<i64: 1, 64>}, {pipeline_mode = #tpu.pipeline_mode<synchronous>, transform_indices = @transform_7, window_bounds = array<i64: 64, 128>}, {pipeline_mode = #tpu.pipeline_mode<synchronous>, transform_indices = @transform_8, window_bounds = array<i64: 1, 128>}, {transform_indices = @transform_9, window_bounds = array<i64: 8, 128>}]} {
    %c0 = arith.constant 0 : index
    %c0_0 = arith.constant 0 : index
    %0 = vector.load %arg1[%c0, %c0_0] : memref<8x16xf32, #tpu.memory_space<vmem>>, vector<8x16xf32>
    %c0_1 = arith.constant 0 : index
    %c0_2 = arith.constant 0 : index
    %1 = vector.load %arg2[%c0_1, %c0_2] : memref<8x4xf32, #tpu.memory_space<vmem>>, vector<8x4xf32>
    %c0_3 = arith.constant 0 : index
    %c0_4 = arith.constant 0 : index
    %2 = vector.load %arg3[%c0_3, %c0_4] : memref<16x64xf32, #tpu.memory_space<vmem>>, vector<16x64xf32>
    %cst = arith.constant dense<0.000000e+00> : vector<8x64xf32>
    %3 = tpu.matmul %0, %2, %cst {dimension_numbers = #tpu.dot_dimension_numbers<[1], [0], [0], [1], [0, 0, 1, 1], [], []>} : vector<8x16xf32>, vector<16x64xf32>, vector<8x64xf32> -> vector<8x64xf32>
    %c0_5 = arith.constant 0 : index
    %c0_6 = arith.constant 0 : index
    %4 = vector.load %arg4[%c0_5, %c0_6] : memref<4x64xf32, #tpu.memory_space<vmem>>, vector<4x64xf32>
    %cst_7 = arith.constant dense<0.000000e+00> : vector<8x64xf32>
    %5 = tpu.matmul %1, %4, %cst_7 {dimension_numbers = #tpu.dot_dimension_numbers<[1], [0], [0], [1], [0, 0, 1, 1], [], []>} : vector<8x4xf32>, vector<4x64xf32>, vector<8x64xf32> -> vector<8x64xf32>
    %6 = arith.addf %3, %5 : vector<8x64xf32>
    %c0_8 = arith.constant 0 : index
    %c0_9 = arith.constant 0 : index
    %7 = vector.load %arg5[%c0_8, %c0_9] : memref<1x64xf32, #tpu.memory_space<vmem>>, vector<1x64xf32>
    %8 = vector.broadcast %7 : vector<1x64xf32> to vector<8x64xf32>
    %9 = arith.addf %6, %8 : vector<8x64xf32>
    %cst_10 = arith.constant 0.000000e+00 : f32
    %10 = vector.broadcast %cst_10 : f32 to vector<8x64xf32>
    %11 = arith.maximumf %9, %10 : vector<8x64xf32>
    %c0_11 = arith.constant 0 : index
    %c0_12 = arith.constant 0 : index
    %12 = vector.load %arg6[%c0_11, %c0_12] : memref<64x64xf32, #tpu.memory_space<vmem>>, vector<64x64xf32>
    %cst_13 = arith.constant dense<0.000000e+00> : vector<8x64xf32>
    %13 = tpu.matmul %11, %12, %cst_13 {dimension_numbers = #tpu.dot_dimension_numbers<[1], [0], [0], [1], [0, 0, 1, 1], [], []>} : vector<8x64xf32>, vector<64x64xf32>, vector<8x64xf32> -> vector<8x64xf32>
    %c0_14 = arith.constant 0 : index
    %c0_15 = arith.constant 0 : index
    %14 = vector.load %arg7[%c0_14, %c0_15] : memref<1x64xf32, #tpu.memory_space<vmem>>, vector<1x64xf32>
    %15 = vector.broadcast %14 : vector<1x64xf32> to vector<8x64xf32>
    %16 = arith.addf %13, %15 : vector<8x64xf32>
    %cst_16 = arith.constant 0.000000e+00 : f32
    %17 = vector.broadcast %cst_16 : f32 to vector<8x64xf32>
    %18 = arith.maximumf %16, %17 : vector<8x64xf32>
    %c0_17 = arith.constant 0 : index
    %c0_18 = arith.constant 0 : index
    %19 = vector.load %arg8[%c0_17, %c0_18] : memref<64x128xf32, #tpu.memory_space<vmem>>, vector<64x128xf32>
    %cst_19 = arith.constant dense<0.000000e+00> : vector<8x128xf32>
    %20 = tpu.matmul %18, %19, %cst_19 {dimension_numbers = #tpu.dot_dimension_numbers<[1], [0], [0], [1], [0, 0, 1, 1], [], []>} : vector<8x64xf32>, vector<64x128xf32>, vector<8x128xf32> -> vector<8x128xf32>
    %c0_20 = arith.constant 0 : index
    %c0_21 = arith.constant 0 : index
    %21 = vector.load %arg9[%c0_20, %c0_21] : memref<1x128xf32, #tpu.memory_space<vmem>>, vector<1x128xf32>
    %22 = vector.broadcast %21 : vector<1x128xf32> to vector<8x128xf32>
    %23 = arith.addf %20, %22 : vector<8x128xf32>
    %24 = tpu.iota {dimensions = array<i32: 1>} : vector<8x128xi32>
    %c32_i32 = arith.constant 32 : i32
    %c0_i32 = arith.constant 0 : i32
    %25 = arith.cmpi eq, %c32_i32, %c0_i32 : i32
    %c1_i32 = arith.constant 1 : i32
    %26 = arith.select %25, %c1_i32, %c32_i32 : i32
    %27 = vector.broadcast %26 : i32 to vector<8x128xi32>
    %28 = arith.remsi %24, %27 : vector<8x128xi32>
    %c0_i32_22 = arith.constant 0 : i32
    %29 = vector.broadcast %c0_i32_22 : i32 to vector<8x128xi32>
    %30 = arith.cmpi ne, %28, %29 : vector<8x128xi32>
    %c0_i32_23 = arith.constant 0 : i32
    %31 = vector.broadcast %c0_i32_23 : i32 to vector<8x128xi32>
    %32 = arith.cmpi slt, %28, %31 : vector<8x128xi32>
    %c0_i32_24 = arith.constant 0 : i32
    %33 = arith.cmpi slt, %26, %c0_i32_24 : i32
    %34 = vector.broadcast %33 : i1 to vector<8x128xi1>
    %35 = vector.broadcast %34 : vector<8x128xi1> to vector<8x128xi1>
    %36 = arith.xori %32, %35 : vector<8x128xi1>
    %37 = arith.andi %36, %30 : vector<8x128xi1>
    %38 = vector.broadcast %26 : i32 to vector<8x128xi32>
    %39 = arith.addi %28, %38 : vector<8x128xi32>
    %40 = arith.select %37, %39, %28 : vector<8x128xi1>, vector<8x128xi32>
    %c16_i32 = arith.constant 16 : i32
    %41 = vector.broadcast %c16_i32 : i32 to vector<8x128xi32>
    %42 = arith.cmpi sge, %40, %41 : vector<8x128xi32>
    %cst_25 = arith.constant -2.000000e+01 : f32
    %cst_26 = arith.constant 2.000000e+00 : f32
    %43 = vector.broadcast %cst_25 : f32 to vector<8x128xf32>
    %44 = arith.maximumf %43, %23 : vector<8x128xf32>
    %45 = vector.broadcast %cst_26 : f32 to vector<8x128xf32>
    %46 = arith.minimumf %45, %44 : vector<8x128xf32>
    %47 = math.exp %46 : vector<8x128xf32>
    %48 = arith.select %42, %47, %23 : vector<8x128xi1>, vector<8x128xf32>
    %c0_27 = arith.constant 0 : index
    %c0_28 = arith.constant 0 : index
    %49 = vector.load %arg10[%c0_27, %c0_28] : memref<8x128xf32, #tpu.memory_space<vmem>>, vector<8x128xf32>
    tpu.vector_store %arg10[%c0_27, %c0_28], %48 {strides = array<i32>} : memref<8x128xf32, #tpu.memory_space<vmem>>, vector<8x128xf32>,
    return
  }
  func.func @transform_0(%arg0: i32) -> (i32, i32) {
    %c0_i32 = arith.constant 0 : i32
    %c0_i32_0 = arith.constant 0 : i32
    return %arg0, %c0_i32 : i32, i32
  }
  func.func @transform_1(%arg0: i32) -> (i32, i32) {
    %c0_i32 = arith.constant 0 : i32
    %c0_i32_0 = arith.constant 0 : i32
    return %arg0, %c0_i32 : i32, i32
  }
  func.func @transform_2(%arg0: i32) -> (i32, i32) {
    %c0_i32 = arith.constant 0 : i32
    %c0_i32_0 = arith.constant 0 : i32
    %c0_i32_1 = arith.constant 0 : i32
    return %c0_i32, %c0_i32_0 : i32, i32
  }
  func.func @transform_3(%arg0: i32) -> (i32, i32) {
    %c0_i32 = arith.constant 0 : i32
    %c0_i32_0 = arith.constant 0 : i32
    %c0_i32_1 = arith.constant 0 : i32
    return %c0_i32, %c0_i32_0 : i32, i32
  }
  func.func @transform_4(%arg0: i32) -> (i32, i32) {
    %c0_i32 = arith.constant 0 : i32
    %c0_i32_0 = arith.constant 0 : i32
    %c0_i32_1 = arith.constant 0 : i32
    return %c0_i32, %c0_i32_0 : i32, i32
  }
  func.func @transform_5(%arg0: i32) -> (i32, i32) {
    %c0_i32 = arith.constant 0 : i32
    %c0_i32_0 = arith.constant 0 : i32
    %c0_i32_1 = arith.constant 0 : i32
    return %c0_i32, %c0_i32_0 : i32, i32
  }
  func.func @transform_6(%arg0: i32) -> (i32, i32) {
    %c0_i32 = arith.constant 0 : i32
    %c0_i32_0 = arith.constant 0 : i32
    %c0_i32_1 = arith.constant 0 : i32
    return %c0_i32, %c0_i32_0 : i32, i32
  }
  func.func @transform_7(%arg0: i32) -> (i32, i32) {
    %c0_i32 = arith.constant 0 : i32
    %c0_i32_0 = arith.constant 0 : i32
    %c0_i32_1 = arith.constant 0 : i32
    return %c0_i32, %c0_i32_0 : i32, i32
  }
  func.func @transform_8(%arg0: i32) -> (i32, i32) {
    %c0_i32 = arith.constant 0 : i32
    %c0_i32_0 = arith.constant 0 : i32
    %c0_i32_1 = arith.constant 0 : i32
    return %c0_i32, %c0_i32_0 : i32, i32
  }
  func.func @transform_9(%arg0: i32) -> (i32, i32) {
    %c0_i32 = arith.constant 0 : i32
    %c0_i32_0 = arith.constant 0 : i32
    return %arg0, %c0_i32 : i32, i32
  }
}

</mosaic_0001>

<bundles_post_ra>
// kernel: morphological_networks_forward.1
= control target key start
LH: loop header
LB: loop body
LE: loop exit
PB: predicated region body
PF: predicated region fallthrough
CT: control target
= control target key end

     0   :  { %14 = vsyncpa [#allocation3], 0  ;;  %s759_s0 = inlined_call_operand.vmem [shape: f32[8,16], index: 0, kind: input, shape index: {}]   ;;  %s760_s1 = inlined_call_operand.vmem [shape: f32[8,4], index: 1, kind: input, shape index: {}]   ;;  %s761_s2 = inlined_call_operand.vmem [shape: f32[16,64], index: 2, kind: input, shape index: {}]   ;;  %s762_s3 = inlined_call_operand.vmem [shape: f32[4,64], index: 3, kind: input, shape index: {}]   ;;  %s763_s4 = inlined_call_operand.vmem [shape: f32[1,64], index: 4, kind: input, shape index: {}]   ;;  %s764_s5 = inlined_call_operand.hbm [shape: f32[64,64], index: 5, kind: input, shape index: {}]   ;;  %s765_s6 = inlined_call_operand.vmem [shape: f32[1,64], index: 6, kind: input, shape index: {}]   ;;  %s766_s7 = inlined_call_operand.hbm [shape: f32[64,128], index: 7, kind: input, shape index: {}]   ;;  %s767_s8 = inlined_call_operand.hbm [shape: f32[1,128], index: 8, kind: input, shape index: {}]   ;;  %s768_s9 = inlined_call_operand.vmem [shape: f32[8,128], index: 9, kind: output, shape index: {}]  }
   0x1   :  { %15 = vsyncpa [#allocation5], 0  ;;  %s630_s30 = smov [#allocation4]   ;;  %s631_s11 = smov [#allocation2]  }
   0x2   :  { %s45_s10 = sshll.u32 %s630_s30, 4  ;;  %s31_s12 = sshll.u32 %s631_s11, 4  ;;  %s46_s10 = int_to_ptr.vmem [resolvable:$true] %s45_s10  ;;  %s688_s12 = int_to_ptr.vmem [resolvable:$true] %s31_s12 }
   0x3   :  { %s560_s15 = scalar_lea.hbm %s766_s7, 1024 }
   0x4   :  { %p561_p0 = scmp.ne.s32.totalorder %s766_s7, %s560_s15  ;;  %p564_p1 = scmp.lt.u32.totalorder %s560_s15, %s766_s7 }
   0x6   :  { %p566_p2 = pnand %p564_p1, %p561_p0 }
   0x8   :  { %569 = shalt.err (!%p566_p2)
}
   0x9   :  { %s570_s20 = scalar_lea.vmem %s46_s10, 1024  ;;  %p575_p4 = scmp.lt.s32.totalorder %s46_s10, %s46_s10 }
   0xa   :  { %p571_p3 = scmp.ne.s32.totalorder %s46_s10, %s570_s20  ;;  %p576_p5 = scmp.lt.s32.totalorder %s570_s20, %s570_s20 }
   0xc   :  { %p577_p6 = por %p576_p5, %p575_p4 }
   0xe   :  { %p578_p7 = pnand %p577_p6, %p571_p3 }
  0x10   :  { %581 = shalt.err (!%p578_p7)
}
  0x11   :  { %s632_s21 = smov 128   ;;  %s633_s22 = smov 8  }
  0x12   :  { %51 = dma.hbm_to_vmem [thread:$0]  %s766_s7, 1024, %s46_s10, [#allocation5], %s632_s21, %s632_s21, %s633_s22  }
  0x13   :  { %s582_s27 = scalar_lea.hbm %s764_s5, 1024 }
  0x14   :  { %p583_p8 = scmp.ne.s32.totalorder %s764_s5, %s582_s27  ;;  %p586_p9 = scmp.lt.u32.totalorder %s582_s27, %s764_s5 }
  0x16   :  { %p588_p10 = pnand %p586_p9, %p583_p8 }
  0x18   :  { %591 = shalt.err (!%p588_p10)
}
  0x19   :  { %s592_s13 = scalar_lea.vmem %s688_s12, 1024  ;;  %p597_p12 = scmp.lt.s32.totalorder %s688_s12, %s688_s12 }
  0x1a   :  { %p593_p11 = scmp.ne.s32.totalorder %s688_s12, %s592_s13  ;;  %p598_p13 = scmp.lt.s32.totalorder %s592_s13, %s592_s13 }
  0x1c   :  { %p599_p0 = por %p598_p13, %p597_p12 }
  0x1e   :  { %p600_p1 = pnand %p599_p0, %p593_p11 }
  0x20   :  { %603 = shalt.err (!%p600_p1)
}
  0x21   :  { %37 = dma.hbm_to_vmem [thread:$0]  %s764_s5, 1024, %s688_s12, [#allocation3], %s632_s21, %s632_s21, %s633_s22  }
  0x22   :  { %s634_s14 = smov [#allocation6]   ;;  %s604_s18 = scalar_lea.hbm %s767_s8, 16 }
  0x23   :  { %s58_s15 = sshll.u32 %s634_s14, 4  ;;  %p605_p2 = scmp.ne.s32.totalorder %s767_s8, %s604_s18  ;;  %s59_s15 = int_to_ptr.vmem [resolvable:$true] %s58_s15 }
  0x24   :  { %p608_p3 = scmp.lt.u32.totalorder %s604_s18, %s767_s8 }
  0x26   :  { %p610_p4 = pnand %p608_p3, %p605_p2 }
  0x28   :  { %613 = shalt.err (!%p610_p4)
}
  0x29   :  { %s614_s25 = scalar_lea.vmem %s59_s15, 16  ;;  %s618_s5 = scalar_lea.vmem %s59_s15, 32 }
  0x2a   :  { %p615_p5 = scmp.ne.s32.totalorder %s59_s15, %s614_s25  ;;  %p619_p6 = scmp.lt.s32.totalorder %s59_s15, %s59_s15 }
  0x2b   :  { %p620_p7 = scmp.lt.s32.totalorder %s618_s5, %s614_s25 }
  0x2d   :  { %p621_p8 = por %p620_p7, %p619_p6 }
  0x2f   :  { %p622_p9 = pnand %p621_p8, %p615_p5 }
  0x31   :  { %625 = shalt.err (!%p622_p9)
}
  0x32   :  { %61 = dma.hbm_to_vmem [thread:$0]  %s767_s8, 16, %s59_s15, [#allocation5]  }
  0x33   :  { %626 = dma.done.wait [#allocation3], 1024  }
  0x34   :  { %627 = vsyncadd [#allocation3], 4294966272 }
  0x35   :  { %628 = dma.done.wait [#allocation5], 1040  }
  0x36   :  { %629 = vsyncadd [#allocation5], 4294966256  ;;  %v635_v0 = vmov 0.0|0.0   ;;  %v636_v1 = vmov 0.0   ;;  %vm637_vm0 = vmmov 0   ;;  %vm80_vm1 = vcmask 1043456  }
  0x37   :  { %523 = vmatprep.subr.bf16.mxu1 %v635_v0  ;;  %473 = vmatprep.subr.mxu0 %v636_v1  ;;  %vm76_vm2 = vcmask 31744   ;;  %v73_v2 = vld [vmem:[%s761_s2] sm:$0xff]  ;;  %v74_v3 = vld [vmem:[%s761_s2 + $0x8] sm:$0xff]  ;;  %v239_v9 = vld [vmem:[#allocation2 + $0x10] sm:$0xff]  ;;  %vm154_vm3 = vcmask 130048   ;;  %vm252_vm4 = vcmask 523264   ;;  %v415_v50 = vlaneseq }
  0x38   :  { %475 = vmatprep.mubr.msk.f32.mxu0 %vm637_vm0, %v636_v1  ;;  %482 = vmatprep.mubr.msk.f32.mxu1 %vm637_vm0, %v636_v1  ;;  %v75_v4 = vld [vmem:[%s762_s3] sm:$0xf]  ;;  %v524_v5 = vpack.c.bf16 %v74_v3, %v73_v2  ;;  %v238_v8 = vld [vmem:[#allocation2 + $0x8] sm:$0xff]  ;;  %v240_v10 = vld [vmem:[#allocation2 + $0x18] sm:$0xff] }
  0x39   :  { %474 = vmatpush3.msk.msra.mxu0 %vm80_vm1, %v75_v4  ;;  %v72_v6 = vld [vmem:[%s760_s1] sm:$0xff]  ;;  %v530_v13 = vpack.c.bf16 %v240_v10, %v239_v9  ;;  %v242_v15 = vld [vmem:[#allocation2 + $0x28] sm:$0xff]  ;;  %v243_v17 = vld [vmem:[#allocation2 + $0x30] sm:$0xff]  ;;  %v416_v53 = vand.u32 127, %v415_v50 }
  0x3a   :  { %v237_v7 = vld [vmem:[#allocation2] sm:$0xff]  ;;  %476 = vmatmul.mubr.msk.f32.vlgmr.msra.gmra.mrb[0].mxu0 %vm76_vm2, %v72_v6  ;;  %526 = vmatprep.subr.bf16.mxu0 %v635_v0  ;;  %v244_v18 = vld [vmem:[#allocation2 + $0x38] sm:$0xff]  ;;  %v328_v21 = vld [vmem:[#allocation4 + $0x8] sm:$0xff] }
  0x3b   :  { %525 = vmatpush3.bf16.msra.mxu1 %v524_v5  ;;  %v71_v11 = vld [vmem:[%s759_s0] sm:$0xff]  ;;  %v527_v12 = vpack.c.bf16 %v238_v8, %v237_v7  ;;  %501 = vmatprep.mubr.msk.f32.mxu0 %vm637_vm0, %v636_v1  ;;  %v536_v19 = vpack.c.bf16 %v244_v18, %v243_v17  ;;  %v329_v22 = vld [vmem:[#allocation4 + $0x10] sm:$0xff]  ;;  %v330_v24 = vld [vmem:[#allocation4 + $0x18] sm:$0xff]  ;;  %v421_v54 = vand.u32 31, %v416_v53 }
  0x3c   :  { %538 = vmatprep.subr.bf16.mxu1 %v635_v0  ;;  %v241_v14 = vld [vmem:[#allocation2 + $0x20] sm:$0xff]  ;;  %v542_v25 = vpack.c.bf16 %v330_v24, %v329_v22  ;;  %v332_v27 = vld [vmem:[#allocation4 + $0x28] sm:$0xff]  ;;  %v333_v37 = vld [vmem:[#allocation4 + $0x30] sm:$0xff] }
  0x3d   :  { %528 = vmatpush3.bf16.msra.mxu0 %v527_v12  ;;  %v533_v16 = vpack.c.bf16 %v242_v15, %v241_v14  ;;  %v327_v20 = vld [vmem:[#allocation4] sm:$0xff]  ;;  %v334_v38 = vld [vmem:[#allocation4 + $0x38] sm:$0xff]  ;;  %vm429_vm5 = vcmp.ge.s32.totalorder %v421_v54, 16 }
  0x3e   :  { %483 = vmatmul.mubr.msk.f32.vlgmr.msra.gmra.mrb[0].mxu1 %vm154_vm3, %v71_v11  ;;  %529 = vmatprep.subr.bf16.mxu0 %v635_v0  ;;  %v539_v23 = vpack.c.bf16 %v328_v21, %v327_v20  ;;  %v331_v26 = vld [vmem:[#allocation4 + $0x20] sm:$0xff]  ;;  %v548_v39 = vpack.c.bf16 %v334_v38, %v333_v37 }
  0x3f   :  { %520 = vmatprep.mubr.msk.f32.mxu1 %vm637_vm0, %v636_v1  ;;  %v545_v28 = vpack.c.bf16 %v332_v27, %v331_v26  ;;  %v445_v32 = vld [vmem:[%s763_s4] ss:$0 sm:$0xff] }
  0x40   :  { %540 = vmatpush3.bf16.msra.mxu1 %v539_v23  ;;  %v446_v40 = vld [vmem:[%s765_s6] ss:$0 sm:$0xff] }
  0x41   :  { %531 = vmatpush3.bf16.msra.mxu0 %v530_v13  ;;  %541 = vmatprep.subr.bf16.mxu1 %v635_v0  ;;  %v448_v45 = vld [vmem:[#allocation6] ss:$0 sm:$0xff] }
  0x42   :  { %532 = vmatprep.subr.bf16.mxu0 %v635_v0 }
  0x44   :  { %543 = vmatpush3.bf16.msra.mxu1 %v542_v25 }
  0x45   :  { %534 = vmatpush3.bf16.msra.mxu0 %v533_v16  ;;  %544 = vmatprep.subr.bf16.mxu1 %v635_v0 }
  0x46   :  { %535 = vmatprep.subr.bf16.mxu0 %v635_v0 }
  0x48   :  { %546 = vmatpush3.bf16.msra.mxu1 %v545_v28 }
  0x49   :  { %537 = vmatpush3.bf16.msra.mxu0 %v536_v19  ;;  %547 = vmatprep.subr.bf16.mxu1 %v635_v0 }
  0x4c   :  { %549 = vmatpush3.bf16.msra.mxu1 %v548_v39 }
 0x10d   :  { %v150_v29 = vpop.f32.mrb[0].mxu0 }
 0x10e   :  { %v477_v30 = vpop.f32.mrb[1].mxu0 }
 0x111   :  { %v224_v31 = vpop.f32.mrb[0].mxu1 }
 0x112   :  { %v225_v33 = vadd.f32 %v224_v31, %v150_v29  ;;  %v484_v34 = vpop.f32.mrb[1].mxu1 }
 0x114   :  { %v235_v35 = vadd.f32 %v445_v32, %v225_v33 }
 0x116   :  { %v236_v36 = vmax.f32 %v235_v35, 0.0 }
 0x118   :  { %502 = vmatmul.mubr.msk.f32.vlgmr.msra.gmra.mrb[2].mxu0 %vm252_vm4, %v236_v36 }
 0x1eb   :  { %v322_v41 = vpop.f32.mrb[2].mxu0 }
 0x1ec   :  { %v323_v42 = vadd.f32 %v446_v40, %v322_v41  ;;  %v503_v43 = vpop.f32.mrb[3].mxu0 }
 0x1ee   :  { %v326_v44 = vmax.f32 %v323_v42, 0.0 }
 0x1f0   :  { %521 = vmatmul.mubr.msk.f32.vlgmr.msra.gmra.mrb[2].mxu1 %vm252_vm4, %v326_v44 }
 0x2c3   :  { %v411_v46 = vpop.f32.mrb[2].mxu1 }
 0x2c4   :  { %v412_v47 = vadd.f32 %v448_v45, %v411_v46  ;;  %v522_v48 = vpop.f32.mrb[3].mxu1 }
 0x2c6   :  { %v430_v49 = vmax.f32 %v412_v47, -20.0 }
 0x2c8   :  { %v431_v51 = vmin.f32 %v430_v49, 2.0 }
 0x2ca   :  { %v432_v52 = vmul.f32 1.442695, %v431_v51 }
 0x2cc   :  { %558 = vpow2.f32 %v432_v52 }
 0x2d6   :  { %v559_v55 = vpop.eup %558 }
 0x2d7   :  { %v434_v56 = vsel %vm429_vm5, %v559_v55, %v412_v47 }
 0x2d8   :  { %435 = vst [vmem:[%s768_s9] sm:$0xff] %v434_v56 }
 0x2d9   :  { %440 = vsyncpa [#allocation3], 1 }
 0x2da   :  { %441 = vsyncpa [#allocation5], 1 }

</bundles_post_ra>
